<compile_context>
chip_gen: v7x
topology: tpu7x:2x2x1
jax: 0.10.0
libtpu: 0.0.40
codegen_flags: <defaults>
</compile_context>

<pallas_src>
import jax
import jax.numpy as jnp
from jax.experimental import pallas as pl
from jax.experimental.pallas import tpu as pltpu


def _round_up(x, m):
    return ((x + m - 1) // m) * m


def _critic_kernel(obs_ref, w1_ref, b1_ref, w2_ref, b2_ref, w3_ref, b3_ref,
                   out_ref):
    # obs_ref: [obs_dim, TILE_B]; activations keep batch on the lane axis.
    x = obs_ref[...]

    # Layer 1: tanh(W1 @ x + b1) -> [h1, TILE_B]   (MXU, lane dim = TILE_B)
    h = jnp.dot(w1_ref[...], x, preferred_element_type=jnp.float32) + b1_ref[...]
    h = jnp.tanh(h)

    # Layer 2: tanh(W2 @ h + b2) -> [h2, TILE_B]
    h = jnp.dot(w2_ref[...], h, preferred_element_type=jnp.float32) + b2_ref[...]
    h = jnp.tanh(h)

    # Output layer (out_features = 1): avoid a degenerate N=1 MXU matmul.
    # VPU multiply + sublane (XLU) reduction: [h2, TILE_B] * [h2, 1] -> sum
    # over the hidden axis -> [1, TILE_B].
    v = jnp.sum(h * w3_ref[...], axis=0, keepdims=True) + b3_ref[...]
    out_ref[...] = v.astype(out_ref.dtype)


def mlp_critic_forward(obs, params, *, max_tile_b=2048):
    """obs: [B, obs_dim] float32. params: dict w1,b1,w2,b2,w3,b3 (see header).

    Returns value estimates of shape [B] (squeeze(-1) like the PyTorch module).
    """
    B, obs_dim = obs.shape
    w1, b1 = params["w1"], params["b1"]
    w2, b2 = params["w2"], params["b2"]
    w3, b3 = params["w3"], params["b3"]

    # Lane-dense batch tiling: multiple of 128 lanes, large enough to hide DMA,
    # capped so tiny batches don't over-pad beyond one 128-wide tile.
    tile_b = min(max_tile_b, _round_up(max(B, 1), 128))
    b_pad = _round_up(B, tile_b)
    grid = (b_pad // tile_b,)

    # Transpose once in the wrapper (batch -> lane axis) and zero-pad the tail.
    obs_t = jnp.pad(obs.T, ((0, 0), (0, b_pad - B)))

    out = pl.pallas_call(
        _critic_kernel,
        out_shape=jax.ShapeDtypeStruct((1, b_pad), jnp.float32),
        grid_spec=pltpu.PrefetchScalarGridSpec(
            num_scalar_prefetch=0,
            grid=grid,
            in_specs=[
                # obs tile: walk the batch (lane) axis.
                pl.BlockSpec((obs_dim, tile_b), lambda i: (0, i)),
                # Weights / biases: constant block index -> VMEM-resident.
                pl.BlockSpec(w1.shape, lambda i: (0, 0)),
                pl.BlockSpec(b1.shape, lambda i: (0, 0)),
                pl.BlockSpec(w2.shape, lambda i: (0, 0)),
                pl.BlockSpec(b2.shape, lambda i: (0, 0)),
                pl.BlockSpec(w3.shape, lambda i: (0, 0)),
                pl.BlockSpec(b3.shape, lambda i: (0, 0)),
            ],
            out_specs=pl.BlockSpec((1, tile_b), lambda i: (0, i)),
        ),
        compiler_params=pltpu.CompilerParams(
            dimension_semantics=("parallel",)),
    )(obs_t, w1, b1, w2, b2, w3, b3)

    # Lane-dense [1, B_pad] -> [B]
    return out[0, :B]


def init_params(key, obs_dim, hidden_sizes):
    """Deterministic init matching PyTorch nn.Linear default scale.

    Hidden layers stored as [out, in] weights and [out, 1] biases; the final
    (out_features=1) layer is stored as a [h_last, 1] column and [1, 1] bias.
    """
    sizes = [obs_dim] + list(hidden_sizes) + [1]
    params = {}
    n_layers = len(sizes) - 1
    for j in range(n_layers):
        key, kw, kb = jax.random.split(key, 3)
        fan_in, fan_out = sizes[j], sizes[j + 1]
        bound = 1.0 / (fan_in ** 0.5)
        if j < n_layers - 1:
            w_shape = (fan_out, fan_in)
            b_shape = (fan_out, 1)
        else:
            w_shape = (fan_in, 1)   # column vector for the VPU+reduce path
            b_shape = (1, 1)
        params[f"w{j + 1}"] = jax.random.uniform(
            kw, w_shape, jnp.float32, -bound, bound)
        params[f"b{j + 1}"] = jax.random.uniform(
            kb, b_shape, jnp.float32, -bound, bound)
    return params


def _reference_forward(obs, params):
    h = jnp.tanh(obs @ params["w1"].T + params["b1"][:, 0])
    h = jnp.tanh(h @ params["w2"].T + params["b2"][:, 0])
    v = h @ params["w3"] + params["b3"][:, 0]
    return jnp.squeeze(v, axis=-1)


if __name__ == "__main__":
    key = jax.random.PRNGKey(0)
    B, obs_dim = 8, 16
    hidden_sizes = (32, 32)

    key, k_obs = jax.random.split(key)
    obs = jax.random.normal(k_obs, (B, obs_dim), jnp.float32)
    params = init_params(key, obs_dim, hidden_sizes)

    v = mlp_critic_forward(obs, params)
    v = jax.block_until_ready(v)

    v_ref = _reference_forward(obs, params)
    assert v.shape == (B,)
    assert jnp.allclose(v, v_ref, atol=1e-5, rtol=1e-5)

    print("KERNEL_OK")
</pallas_src>

<mosaic_0001>
module attributes {stable_mosaic.version = 11 : i64} {
  func.func @_critic_kernel(%arg0: i32, %arg1: memref<16x128xf32, #tpu.memory_space<vmem>>, %arg2: memref<32x16xf32, #tpu.memory_space<vmem>>, %arg3: memref<32x1xf32, #tpu.memory_space<vmem>>, %arg4: memref<32x32xf32, #tpu.memory_space<vmem>>, %arg5: memref<32x1xf32, #tpu.memory_space<vmem>>, %arg6: memref<32x1xf32, #tpu.memory_space<vmem>>, %arg7: memref<1x1xf32, #tpu.memory_space<vmem>>, %arg8: memref<1x128xf32, #tpu.memory_space<vmem>>) attributes {dimension_semantics = [#tpu.dimension_semantics<parallel>], iteration_bounds = array<i64: 1>, scalar_prefetch = 0 : i64, scratch_operands = 0 : i64, tpu.core_type = #tpu.core_type<tc>, window_params = [{transform_indices = @transform_0, window_bounds = array<i64: 16, 128>}, {pipeline_mode = #tpu.pipeline_mode<synchronous>, transform_indices = @transform_1, window_bounds = array<i64: 32, 16>}, {pipeline_mode = #tpu.pipeline_mode<synchronous>, transform_indices = @transform_2, window_bounds = array<i64: 32, 1>}, {pipeline_mode = #tpu.pipeline_mode<synchronous>, transform_indices = @transform_3, window_bounds = array<i64: 32, 32>}, {pipeline_mode = #tpu.pipeline_mode<synchronous>, transform_indices = @transform_4, window_bounds = array<i64: 32, 1>}, {pipeline_mode = #tpu.pipeline_mode<synchronous>, transform_indices = @transform_5, window_bounds = array<i64: 32, 1>}, {pipeline_mode = #tpu.pipeline_mode<synchronous>, transform_indices = @transform_6, window_bounds = array<i64: 1, 1>}, {transform_indices = @transform_7, window_bounds = array<i64: 1, 128>}]} {
    %c0 = arith.constant 0 : index
    %c0_0 = arith.constant 0 : index
    %0 = vector.load %arg1[%c0, %c0_0] : memref<16x128xf32, #tpu.memory_space<vmem>>, vector<16x128xf32>
    %c0_1 = arith.constant 0 : index
    %c0_2 = arith.constant 0 : index
    %1 = vector.load %arg2[%c0_1, %c0_2] : memref<32x16xf32, #tpu.memory_space<vmem>>, vector<32x16xf32>
    %cst = arith.constant dense<0.000000e+00> : vector<32x128xf32>
    %2 = tpu.matmul %1, %0, %cst {dimension_numbers = #tpu.dot_dimension_numbers<[1], [0], [0], [1], [0, 0, 1, 1], [], []>} : vector<32x16xf32>, vector<16x128xf32>, vector<32x128xf32> -> vector<32x128xf32>
    %c0_3 = arith.constant 0 : index
    %c0_4 = arith.constant 0 : index
    %3 = vector.load %arg3[%c0_3, %c0_4] : memref<32x1xf32, #tpu.memory_space<vmem>>, vector<32x1xf32>
    %4 = vector.broadcast %3 : vector<32x1xf32> to vector<32x128xf32>
    %5 = arith.addf %2, %4 : vector<32x128xf32>
    %6 = math.tanh %5 : vector<32x128xf32>
    %c0_5 = arith.constant 0 : index
    %c0_6 = arith.constant 0 : index
    %7 = vector.load %arg4[%c0_5, %c0_6] : memref<32x32xf32, #tpu.memory_space<vmem>>, vector<32x32xf32>
    %cst_7 = arith.constant dense<0.000000e+00> : vector<32x128xf32>
    %8 = tpu.matmul %7, %6, %cst_7 {dimension_numbers = #tpu.dot_dimension_numbers<[1], [0], [0], [1], [0, 0, 1, 1], [], []>} : vector<32x32xf32>, vector<32x128xf32>, vector<32x128xf32> -> vector<32x128xf32>
    %c0_8 = arith.constant 0 : index
    %c0_9 = arith.constant 0 : index
    %9 = vector.load %arg5[%c0_8, %c0_9] : memref<32x1xf32, #tpu.memory_space<vmem>>, vector<32x1xf32>
    %10 = vector.broadcast %9 : vector<32x1xf32> to vector<32x128xf32>
    %11 = arith.addf %8, %10 : vector<32x128xf32>
    %12 = math.tanh %11 : vector<32x128xf32>
    %c0_10 = arith.constant 0 : index
    %c0_11 = arith.constant 0 : index
    %13 = vector.load %arg6[%c0_10, %c0_11] : memref<32x1xf32, #tpu.memory_space<vmem>>, vector<32x1xf32>
    %14 = vector.broadcast %13 : vector<32x1xf32> to vector<32x128xf32>
    %15 = arith.mulf %12, %14 : vector<32x128xf32>
    %cst_12 = arith.constant dense<0.000000e+00> : vector<128xf32>
    %16 = vector.multi_reduction <add>, %15, %cst_12 [0] : vector<32x128xf32> to vector<128xf32>
    %17 = vector.shape_cast %16 : vector<128xf32> to vector<1x128xf32>
    %c0_13 = arith.constant 0 : index
    %c0_14 = arith.constant 0 : index
    %18 = vector.load %arg7[%c0_13, %c0_14] : memref<1x1xf32, #tpu.memory_space<vmem>>, vector<1x1xf32>
    %19 = vector.broadcast %18 : vector<1x1xf32> to vector<1x128xf32>
    %20 = arith.addf %17, %19 : vector<1x128xf32>
    %c0_15 = arith.constant 0 : index
    %c0_16 = arith.constant 0 : index
    %21 = vector.load %arg8[%c0_15, %c0_16] : memref<1x128xf32, #tpu.memory_space<vmem>>, vector<1x128xf32>
    tpu.vector_store %arg8[%c0_15, %c0_16], %20 {strides = array<i32>} : memref<1x128xf32, #tpu.memory_space<vmem>>, vector<1x128xf32>,
    return
  }
  func.func @transform_0(%arg0: i32) -> (i32, i32) {
    %c0_i32 = arith.constant 0 : i32
    %c0_i32_0 = arith.constant 0 : i32
    return %c0_i32, %arg0 : i32, i32
  }
  func.func @transform_1(%arg0: i32) -> (i32, i32) {
    %c0_i32 = arith.constant 0 : i32
    %c0_i32_0 = arith.constant 0 : i32
    %c0_i32_1 = arith.constant 0 : i32
    return %c0_i32, %c0_i32_0 : i32, i32
  }
  func.func @transform_2(%arg0: i32) -> (i32, i32) {
    %c0_i32 = arith.constant 0 : i32
    %c0_i32_0 = arith.constant 0 : i32
    %c0_i32_1 = arith.constant 0 : i32
    return %c0_i32, %c0_i32_0 : i32, i32
  }
  func.func @transform_3(%arg0: i32) -> (i32, i32) {
    %c0_i32 = arith.constant 0 : i32
    %c0_i32_0 = arith.constant 0 : i32
    %c0_i32_1 = arith.constant 0 : i32
    return %c0_i32, %c0_i32_0 : i32, i32
  }
  func.func @transform_4(%arg0: i32) -> (i32, i32) {
    %c0_i32 = arith.constant 0 : i32
    %c0_i32_0 = arith.constant 0 : i32
    %c0_i32_1 = arith.constant 0 : i32
    return %c0_i32, %c0_i32_0 : i32, i32
  }
  func.func @transform_5(%arg0: i32) -> (i32, i32) {
    %c0_i32 = arith.constant 0 : i32
    %c0_i32_0 = arith.constant 0 : i32
    %c0_i32_1 = arith.constant 0 : i32
    return %c0_i32, %c0_i32_0 : i32, i32
  }
  func.func @transform_6(%arg0: i32) -> (i32, i32) {
    %c0_i32 = arith.constant 0 : i32
    %c0_i32_0 = arith.constant 0 : i32
    %c0_i32_1 = arith.constant 0 : i32
    return %c0_i32, %c0_i32_0 : i32, i32
  }
  func.func @transform_7(%arg0: i32) -> (i32, i32) {
    %c0_i32 = arith.constant 0 : i32
    %c0_i32_0 = arith.constant 0 : i32
    return %c0_i32, %arg0 : i32, i32
  }
}

</mosaic_0001>

<bundles_post_ra>
// kernel: tpu_custom_call.1
= control target key start
LH: loop header
LB: loop body
LE: loop exit
PB: predicated region body
PF: predicated region fallthrough
CT: control target
= control target key end

     0   :  { %s587_s0 = inlined_call_operand.vmem [shape: f32[16,128], index: 0, kind: input, shape index: {}]   ;;  %s588_s1 = inlined_call_operand.vmem [shape: f32[32,16], index: 1, kind: input, shape index: {}]   ;;  %s589_s2 = inlined_call_operand.vmem [shape: f32[32,1], index: 2, kind: input, shape index: {}]   ;;  %s590_s3 = inlined_call_operand.vmem [shape: f32[32,32], index: 3, kind: input, shape index: {}]   ;;  %s591_s4 = inlined_call_operand.vmem [shape: f32[32,1], index: 4, kind: input, shape index: {}]   ;;  %s592_s5 = inlined_call_operand.vmem [shape: f32[32,1], index: 5, kind: input, shape index: {}]   ;;  %s593_s6 = inlined_call_operand.<no memory space> [shape: f32[1,1], index: 6, kind: input, shape index: {}]   ;;  %s594_s7 = inlined_call_operand.hbm [shape: f32[1,128], index: 7, kind: output, shape index: {}]  }
   0x1   :  { %v12_v0 = vstv %s593_s6 }
   0x2   :  { %13 = vst [vmem:[#allocation2] sm:$0x1] %v12_v0 }
   0x3   :  { %v29_v1 = vld [vmem:[%s587_s0] sm:$0xff]  ;;  %v30_v2 = vld [vmem:[%s587_s0 + $0x8] sm:$0xff]  ;;  %vm59_vm0 = vcmask 130048   ;;  %v456_v5 = vmov 0   ;;  %v37_v7 = vld [vmem:[%s589_s2 + $0x10] sm:$0xff] }
   0x4   :  { %v31_v3 = vld [vmem:[%s588_s1] sm:$0xff]  ;;  %v400_v4 = vpack.c.bf16 %v30_v2, %v29_v1  ;;  %414 = vset.pattern.permute.xlu0 %v456_v5  ;;  %415 = vset.pattern.permute.xlu1 %v456_v5  ;;  %v32_v8 = vld [vmem:[%s588_s1 + $0x8] sm:$0xff]  ;;  %v33_v10 = vld [vmem:[%s588_s1 + $0x10] sm:$0xff] }
   0x5   :  { %380 = vmatprep.mubr.msk.f32.mxu0 %vm59_vm0, %v31_v3  ;;  %v35_v6 = vld [vmem:[%s589_s2] sm:$0xff]  ;;  %v36_v9 = vld [vmem:[%s589_s2 + $0x8] sm:$0xff]  ;;  %51 = vperm.xlu1 %415, %v37_v7   ;;  %v38_v11 = vld [vmem:[%s589_s2 + $0x18] sm:$0xff] }
   0x6   :  { %401 = vmatprep.subr.bf16.mxu0 %v400_v4  ;;  %41 = vperm.xlu0 %414, %v35_v6  }
   0x7   :  { %403 = vmatpush3.bf16.msra.mxu0 %v400_v4 }
   0x8   :  { %14 = vsyncpa [#allocation4], 0  ;;  %v34_v12 = vld [vmem:[%s588_s1 + $0x18] sm:$0xff]  ;;  %v165_v13 = vld [vmem:[%s591_s4] sm:$0xff]  ;;  %vm189_vm1 = vcmask 261120   ;;  %v334_v6 = vlaneseq }
   0x9   :  { %56 = vperm.xlu1 %415, %v38_v11   ;;  %v166_v14 = vld [vmem:[%s591_s4 + $0x8] sm:$0xff]  ;;  %v167_v15 = vld [vmem:[%s591_s4 + $0x10] sm:$0xff]  ;;  %v168_v16 = vld [vmem:[%s591_s4 + $0x18] sm:$0xff] }
   0xa   :  { %381 = vmatmul.mubr.msk.f32.vlgmr.msra.gmra.mrb[0].mxu0 %vm59_vm0, %v32_v8  ;;  %46 = vperm.xlu0 %414, %v36_v9   ;;  %v291_v17 = vld [vmem:[%s592_s5] sm:$0xff]  ;;  %v292_v18 = vld [vmem:[%s592_s5 + $0x8] sm:$0xff]  ;;  %v293_v19 = vld [vmem:[%s592_s5 + $0x10] sm:$0xff]  ;;  %v335_v9 = vshrl.u32 %v334_v6, 7 }
   0xb   :  { %383 = vmatprep.mubr.msk.f32.mxu0 %vm59_vm0, %v33_v10  ;;  %v294_v20 = vld [vmem:[%s592_s5 + $0x18] sm:$0xff]  ;;  %v328_v21 = vld [vmem:[#allocation2] sm:$0x1]  ;;  %v162_v41 = vld [vmem:[%s590_s3 + $0x8] sm:$0xff] }
   0xc   :  { %v161_v22 = vld [vmem:[%s590_s3] sm:$0xff]  ;;  %v163_v42 = vld [vmem:[%s590_s3 + $0x10] sm:$0xff]  ;;  %v164_v43 = vld [vmem:[%s590_s3 + $0x18] sm:$0xff]  ;;  %s457_s3 = smov [#allocation3]  }
   0xd   :  { %176 = vperm.xlu1 %415, %v166_v14   ;;  %394 = vmatprep.mubr.msk.f32.mxu1 %vm189_vm1, %v161_v22  ;;  %s346_s16 = sshll.u32 %s457_s3, 4  ;;  %s347_s16 = int_to_ptr.vmem [resolvable:$true] %s346_s16 }
   0xe   :  { %384 = vmatmul.mubr.msk.f32.gmra.mrb[2].mxu0 %vm59_vm0, %v34_v12  ;;  %171 = vperm.xlu0 %414, %v165_v13   ;;  %v336_v12 = vsub.s32 0, %v335_v9  ;;  %s432_s17 = scalar_lea.vmem %s347_s16, 16  ;;  %s436_s18 = scalar_lea.vmem %s347_s16, 32 }
   0xf   :  { %p433_p0 = scmp.ne.s32.totalorder %s347_s16, %s432_s17  ;;  %p437_p1 = scmp.lt.s32.totalorder %s347_s16, %s347_s16 }
  0x10   :  { %p438_p2 = scmp.lt.s32.totalorder %s436_s18, %s432_s17 }
  0x11   :  { %186 = vperm.xlu1 %415, %v168_v16  }
  0x12   :  { %181 = vperm.xlu0 %414, %v167_v15   ;;  %p439_p3 = por %p438_p2, %p437_p1 }
  0x14   :  { %p440_p4 = pnand %p439_p3, %p433_p0 }
  0x15   :  { %302 = vperm.xlu1 %415, %v292_v18  }
  0x16   :  { %297 = vperm.xlu0 %414, %v291_v17  }
  0x19   :  { %312 = vperm.xlu1 %415, %v294_v20  }
  0x1a   :  { %307 = vperm.xlu0 %414, %v293_v19  }
  0x1e   :  { %331 = vperm.xlu0 %414, %v328_v21  }
  0x84   :  { %v52_v24 = vpop.permute.xlu1 %51 }
  0x85   :  { %v42_v23 = vpop.permute.xlu0 %41 }
  0x88   :  { %v57_v30 = vpop.permute.xlu1 %56 }
  0x89   :  { %v47_v25 = vpop.permute.xlu0 %46 }
  0x8c   :  { %v177_v44 = vpop.permute.xlu1 %176 }
  0x8d   :  { %v172_v45 = vpop.permute.xlu0 %171 }
  0x90   :  { %v187_v50 = vpop.permute.xlu1 %186 }
  0x91   :  { %v182_v52 = vpop.permute.xlu0 %181 }
  0x94   :  { %v303_v58 = vpop.permute.xlu1 %302 }
  0x95   :  { %v298_v56 = vpop.permute.xlu0 %297 }
  0x98   :  { %v313_v3 = vpop.permute.xlu1 %312 }
  0x99   :  { %v308_v1 = vpop.permute.xlu0 %307 }
  0x9d   :  { %v332_v14 = vpop.permute.xlu0 %331 }
  0x9e   :  { %v337_v16 = vrot.slane %v332_v14, %v336_v12 }
  0xdd   :  { %v382_v26 = vpop.f32.mrb[0].mxu0 }
  0xde   :  { %v144_v27 = vadd.f32 %v382_v26, %v47_v25  ;;  %v138_v28 = vpop.f32.mrb[1].mxu0 }
  0xdf   :  { %v139_v29 = vadd.f32 %v138_v28, %v42_v23 }
  0xe0   :  { %416 = vtanh.f32 %v144_v27 }
  0xe1   :  { %418 = vtanh.f32 %v139_v29  ;;  %v385_v31 = vpop.f32.mrb[2].mxu0 }
  0xe2   :  { %v154_v32 = vadd.f32 %v385_v31, %v57_v30  ;;  %v148_v33 = vpop.f32.mrb[3].mxu0 }
  0xe3   :  { %v149_v34 = vadd.f32 %v148_v33, %v52_v24 }
  0xe4   :  { %420 = vtanh.f32 %v154_v32 }
  0xe5   :  { %422 = vtanh.f32 %v149_v34 }
  0xea   :  { %v417_v35 = vpop.eup %416 }
  0xeb   :  { %v419_v36 = vpop.eup %418 }
  0xec   :  { %v404_v37 = vpack.c.bf16 %v417_v35, %v419_v36 }
  0xee   :  { %v421_v38 = vpop.eup %420  ;;  %405 = vmatprep.subr.bf16.mxu1 %v404_v37 }
  0xef   :  { %v423_v39 = vpop.eup %422  ;;  %407 = vmatpush3.bf16.msra.mxu1 %v404_v37 }
  0xf0   :  { %v408_v40 = vpack.c.bf16 %v421_v38, %v423_v39 }
  0xf2   :  { %409 = vmatprep.subr.bf16.mxu1 %v408_v40 }
  0xf3   :  { %411 = vmatpush3.bf16.msra.mxu1 %v408_v40 }
  0xf6   :  { %395 = vmatmul.mubr.msk.f32.vlgmr.msra.gmra.mrb[0].mxu1 %vm189_vm1, %v162_v41 }
  0xf7   :  { %397 = vmatprep.mubr.msk.f32.mxu1 %vm189_vm1, %v163_v42 }
  0xfa   :  { %398 = vmatmul.mubr.msk.f32.gmra.mrb[2].mxu1 %vm189_vm1, %v164_v43 }
 0x1c9   :  { %v396_v46 = vpop.f32.mrb[0].mxu1 }
 0x1ca   :  { %v274_v47 = vadd.f32 %v396_v46, %v177_v44  ;;  %v268_v48 = vpop.f32.mrb[1].mxu1 }
 0x1cb   :  { %v269_v49 = vadd.f32 %v268_v48, %v172_v45 }
 0x1cc   :  { %424 = vtanh.f32 %v274_v47 }
 0x1cd   :  { %426 = vtanh.f32 %v269_v49  ;;  %v399_v51 = vpop.f32.mrb[2].mxu1 }
 0x1ce   :  { %v284_v53 = vadd.f32 %v399_v51, %v187_v50  ;;  %v278_v54 = vpop.f32.mrb[3].mxu1 }
 0x1cf   :  { %v279_v55 = vadd.f32 %v278_v54, %v182_v52 }
 0x1d0   :  { %428 = vtanh.f32 %v284_v53 }
 0x1d1   :  { %430 = vtanh.f32 %v279_v55 }
 0x1d6   :  { %v425_v57 = vpop.eup %424 }
 0x1d7   :  { %v427_v59 = vpop.eup %426  ;;  %v316_v60 = vmul.f32 %v425_v57, %v303_v58 }
 0x1d8   :  { %v315_v61 = vmul.f32 %v427_v59, %v298_v56 }
 0x1da   :  { %v429_v62 = vpop.eup %428  ;;  %v319_v63 = vadd.f32 %v316_v60, %v315_v61 }
 0x1db   :  { %v431_v0 = vpop.eup %430  ;;  %v318_v4 = vmul.f32 %v429_v62, %v313_v3 }
 0x1dc   :  { %v317_v2 = vmul.f32 %v431_v0, %v308_v1 }
 0x1de   :  { %v320_v5 = vadd.f32 %v319_v63, %v317_v2 }
 0x1e0   :  { %v321_v7 = vadd.f32 %v320_v5, %v318_v4 }
 0x1e2   :  { %v322_v8 = vrot.slane %v321_v7, 4 }
 0x1e4   :  { %v323_v10 = vadd.f32 %v322_v8, %v321_v7 }
 0x1e6   :  { %v324_v11 = vrot.slane %v323_v10, 2 }
 0x1e8   :  { %v325_v13 = vadd.f32 %v324_v11, %v323_v10 }
 0x1ea   :  { %v326_v15 = vrot.slane %v325_v13, 1 }
 0x1ec   :  { %v327_v17 = vadd.f32 %v326_v15, %v325_v13 }
 0x1ee   :  { %v338_v18 = vadd.f32 %v337_v16, %v327_v17 }
 0x1f0   :  { %339 = vst [vmem:[#allocation3] sm:$0x1] %v338_v18 }
 0x1f1   :  { %443 = shalt.err (!%p440_p4)
}
 0x1f2   :  { %s444_s21 = scalar_lea.hbm %s594_s7, 16 }
 0x1f3   :  { %p445_p5 = scmp.ne.s32.totalorder %s594_s7, %s444_s21  ;;  %p448_p6 = scmp.lt.u32.totalorder %s444_s21, %s594_s7 }
 0x1f5   :  { %p450_p7 = pnand %p448_p6, %p445_p5 }
 0x1f7   :  { %453 = shalt.err (!%p450_p7)
}
 0x1f8   :  { %349 = dma.vmem_to_hbm [thread:$0]  %s347_s16, 16, %s594_s7, [#allocation4]  }
 0x1f9   :  { %454 = dma.done.wait [#allocation4], 16  }
 0x1fa   :  { %455 = vsyncadd [#allocation4], 4294967280 }
 0x1fb   :  { %353 = vsyncpa [#allocation4], 1 }

</bundles_post_ra>
